<compile_context>
chip_gen: v7x
topology: tpu7x:2x2x1
jax: 0.10.0
libtpu: 0.0.40
codegen_flags: <defaults>
</compile_context>

<pallas_src>
import jax
import jax.numpy as jnp
import numpy as np
from jax.experimental import pallas as pl
from jax.experimental.pallas import tpu as pltpu


# Fixed decoder geometry (canonical ADAE: z is (N, 32, 4, 4) -> image (N, 3, 16, 16)).
C0, H0, W0 = 32, 4, 4
C1, C2, C3 = 16, 8, 3
H1, W1 = 2 * H0, 2 * W0        # 8, 8
H2, W2 = 2 * H1, 2 * W1        # 16, 16


# ----------------------------------------------------------------------------
# One-time weight packing (outside the jit'd forward): block-Toeplitz GEMM operands.
# ----------------------------------------------------------------------------
def _pack_deconv_phase(wt, win, pr):
    """Block-Toeplitz GEMM weight for one output-row phase of ConvTranspose2d(k4,s2,p1).

    wt: (Cin, Cout, 4, 4) PyTorch transposed-conv weight.
    Rows index (h_tap a, iw, ci) over the UNPADDED input width (w-boundary handled by
    omission); cols index (ow, co).  Output row oh = 2*m + pr reads input rows
    ih = m-1, m (pr=0) / m, m+1 (pr=1), supplied by the kernel as two shifted
    row-slices of the h-padded activation (tap a = slice index).
    """
    wt = np.asarray(wt, np.float32)
    cin, cout = wt.shape[0], wt.shape[1]
    wout = 2 * win
    kh_for_a = (3, 1) if pr == 0 else (2, 0)
    mat = np.zeros((2 * win * cin, wout * cout), np.float32)
    for a, kh in enumerate(kh_for_a):
        for ow in range(wout):
            q, pc = divmod(ow, 2)
            taps = ((q - 1, 3), (q, 1)) if pc == 0 else ((q, 2), (q + 1, 0))
            for iw, kw in taps:
                if 0 <= iw < win:
                    r0 = (a * win + iw) * cin
                    c0 = ow * cout
                    mat[r0:r0 + cin, c0:c0 + cout] = wt[:, :, kh, kw]
    return mat


def _pack_conv3x3(w, win):
    """Block-Toeplitz GEMM weight for Conv2d(k3,s1,p1). w: (Cout, Cin, 3, 3).
    Rows index (kh, iw, ci); cols index (ow, co)."""
    w = np.asarray(w, np.float32)
    cin = w.shape[1]
    cout = w.shape[0]
    mat = np.zeros((3 * win * cin, win * cout), np.float32)
    for kh in range(3):
        for ow in range(win):
            for kw in range(3):
                iw = ow + kw - 1
                if 0 <= iw < win:
                    r0 = (kh * win + iw) * cin
                    c0 = ow * cout
                    mat[r0:r0 + cin, c0:c0 + cout] = w[:, :, kh, kw].T  # (Cin, Cout)
    return mat


def pack_params(params):
    """One-time packing of PyTorch-layout params into bf16 GEMM weights + f32 bias tiles."""
    b1 = np.asarray(params["b1"], np.float32)
    b2 = np.asarray(params["b2"], np.float32)
    b3 = np.asarray(params["b3"], np.float32)
    return {
        "w1a": jnp.asarray(_pack_deconv_phase(params["wt1"], W0, 0), jnp.bfloat16),
        "w1b": jnp.asarray(_pack_deconv_phase(params["wt1"], W0, 1), jnp.bfloat16),
        "w2a": jnp.asarray(_pack_deconv_phase(params["wt2"], W1, 0), jnp.bfloat16),
        "w2b": jnp.asarray(_pack_deconv_phase(params["wt2"], W1, 1), jnp.bfloat16),
        "w3": jnp.asarray(_pack_conv3x3(params["w3"], W2), jnp.bfloat16),
        "b1": jnp.asarray(np.tile(b1, W1)[None, :], jnp.float32),   # (1, 128), lane=(ow,co)
        "b2": jnp.asarray(np.tile(b2, W2)[None, :], jnp.float32),   # (1, 128)
        "b3": jnp.asarray(np.tile(b3, W2)[None, :], jnp.float32),   # (1, 48)
    }


# ----------------------------------------------------------------------------
# Fused decoder kernel: one grid step per batch element, all layers in VMEM.
# ----------------------------------------------------------------------------
def _decoder_kernel(z_ref, w1a_ref, w1b_ref, w2a_ref, w2b_ref, w3_ref,
                    b1_ref, b2_ref, b3_ref, o_ref, zp, h1p, h2p):
    bf16 = jnp.bfloat16

    # Stage z with one zero row of h-padding on each side (w-padding is folded into the
    # block-Toeplitz weights, so lanes stay exactly W*C = 128 wide).
    zp[...] = jnp.zeros_like(zp)
    zp[1:1 + H0, :] = z_ref[...]

    # ---- layer 1: ConvTranspose2d(32->16, k4, s2, p1) + ReLU -------------------------
    # Phase pr (output row parity) = one GEMM: (H0, 2*W0*C0) @ (2*W0*C0, W1*C1).
    h1p[...] = jnp.zeros_like(h1p)
    for pr, w_ref in ((0, w1a_ref), (1, w1b_ref)):
        a = jnp.concatenate([zp[pr:pr + H0, :], zp[pr + 1:pr + 1 + H0, :]], axis=1)
        y = jnp.dot(a.astype(bf16), w_ref[...], preferred_element_type=jnp.float32)
        y = jnp.maximum(y + b1_ref[...], 0.0)
        for m in range(H0):                    # interleave phase rows into padded h1
            h1p[1 + 2 * m + pr:2 + 2 * m + pr, :] = y[m:m + 1, :]

    # ---- layer 2: ConvTranspose2d(16->8, k4, s2, p1) + ReLU --------------------------
    h2p[...] = jnp.zeros_like(h2p)
    for pr, w_ref in ((0, w2a_ref), (1, w2b_ref)):
        a = jnp.concatenate([h1p[pr:pr + H1, :], h1p[pr + 1:pr + 1 + H1, :]], axis=1)
        y = jnp.dot(a.astype(bf16), w_ref[...], preferred_element_type=jnp.float32)
        y = jnp.maximum(y + b2_ref[...], 0.0)
        for m in range(H1):
            h2p[1 + 2 * m + pr:2 + 2 * m + pr, :] = y[m:m + 1, :]

    # ---- layer 3: Conv2d(8->3, k3, s1, p1) + Tanh ------------------------------------
    a = jnp.concatenate([h2p[0:H2, :], h2p[1:1 + H2, :], h2p[2:2 + H2, :]], axis=1)
    y = jnp.dot(a.astype(bf16), w3_ref[...], preferred_element_type=jnp.float32)
    o_ref[...] = jnp.tanh(y + b3_ref[...])     # (16, 48), lanes = (ow, co)


@jax.jit
def image_decoder_forward(packed, z):
    n = z.shape[0]
    assert z.shape[1:] == (C0, H0, W0), z.shape
    # rows = h, lanes = (w, c) : (N, 4, 128). Tiny layout-only glue outside the kernel.
    z2 = z.transpose(0, 2, 3, 1).reshape(n, H0, W0 * C0)

    out = pl.pallas_call(
        _decoder_kernel,
        out_shape=jax.ShapeDtypeStruct((n, H2, W2 * C3), jnp.float32),
        grid_spec=pltpu.PrefetchScalarGridSpec(
            num_scalar_prefetch=0,
            grid=(n,),
            in_specs=[
                pl.BlockSpec((None, H0, W0 * C0), lambda i: (i, 0, 0)),        # z
                pl.BlockSpec((2 * W0 * C0, W1 * C1), lambda i: (0, 0)),        # w1a
                pl.BlockSpec((2 * W0 * C0, W1 * C1), lambda i: (0, 0)),        # w1b
                pl.BlockSpec((2 * W1 * C1, W2 * C2), lambda i: (0, 0)),        # w2a
                pl.BlockSpec((2 * W1 * C1, W2 * C2), lambda i: (0, 0)),        # w2b
                pl.BlockSpec((3 * W2 * C2, W2 * C3), lambda i: (0, 0)),        # w3
                pl.BlockSpec((1, W1 * C1), lambda i: (0, 0)),                  # b1
                pl.BlockSpec((1, W2 * C2), lambda i: (0, 0)),                  # b2
                pl.BlockSpec((1, W2 * C3), lambda i: (0, 0)),                  # b3
            ],
            out_specs=pl.BlockSpec((None, H2, W2 * C3), lambda i: (i, 0, 0)),
            scratch_shapes=[
                pltpu.VMEM((H0 + 2, W0 * C0), jnp.float32),   # z, h-padded      (6, 128)
                pltpu.VMEM((H1 + 2, W1 * C1), jnp.float32),   # layer-1 act      (10, 128)
                pltpu.VMEM((H2 + 2, W2 * C2), jnp.float32),   # layer-2 act      (18, 128)
            ]),
        compiler_params=pltpu.CompilerParams(
            dimension_semantics=("parallel",)),
    )(z2, packed["w1a"], packed["w1b"], packed["w2a"], packed["w2b"],
      packed["w3"], packed["b1"], packed["b2"], packed["b3"])

    # kernel output layout (n, oh, ow*3 + c) -> NCHW
    return out.reshape(n, H2, W2, C3).transpose(0, 3, 1, 2)


# ----------------------------------------------------------------------------
# Params + pure-XLA reference (numerical sanity check of the fused Pallas path).
# ----------------------------------------------------------------------------
def init_params(key):
    ks = jax.random.split(key, 6)
    s = 0.1
    return {
        "wt1": s * jax.random.normal(ks[0], (C0, C1, 4, 4), jnp.float32),
        "b1": s * jax.random.normal(ks[1], (C1,), jnp.float32),
        "wt2": s * jax.random.normal(ks[2], (C1, C2, 4, 4), jnp.float32),
        "b2": s * jax.random.normal(ks[3], (C2,), jnp.float32),
        "w3": s * jax.random.normal(ks[4], (C3, C2, 3, 3), jnp.float32),
        "b3": s * jax.random.normal(ks[5], (C3,), jnp.float32),
    }


def _conv_t_ref(x, wt, b, stride, padding):
    kh, kw = wt.shape[2], wt.shape[3]
    w = jnp.flip(wt, (2, 3)).transpose(1, 0, 2, 3)
    y = jax.lax.conv_general_dilated(
        x, w, window_strides=(1, 1),
        padding=[(kh - 1 - padding,) * 2, (kw - 1 - padding,) * 2],
        lhs_dilation=(stride, stride),
        dimension_numbers=("NCHW", "OIHW", "NCHW"))
    return y + b[None, :, None, None]


def _conv_ref(x, w, b, padding):
    y = jax.lax.conv_general_dilated(
        x, w, (1, 1), [(padding, padding)] * 2,
        dimension_numbers=("NCHW", "OIHW", "NCHW"))
    return y + b[None, :, None, None]


def image_decoder_reference(params, z):
    h = jax.nn.relu(_conv_t_ref(z, params["wt1"], params["b1"], 2, 1))
    h = jax.nn.relu(_conv_t_ref(h, params["wt2"], params["b2"], 2, 1))
    return jnp.tanh(_conv_ref(h, params["w3"], params["b3"], 1))


if __name__ == "__main__":
    key = jax.random.PRNGKey(0)
    kz, kp = jax.random.split(key)
    N = 2
    z = jax.random.normal(kz, (N, C0, H0, W0), jnp.float32)
    params = init_params(kp)
    packed = pack_params(params)

    out = jax.block_until_ready(image_decoder_forward(packed, z))
    assert out.shape == (N, C3, H2, W2), out.shape

    ref = jax.block_until_ready(image_decoder_reference(params, z))
    np.testing.assert_allclose(np.asarray(out), np.asarray(ref), atol=5e-2, rtol=5e-2)

    print("KERNEL_OK")
</pallas_src>

<mosaic_0001>
module attributes {stable_mosaic.version = 11 : i64} {
  func.func @_decoder_kernel(%arg0: i32, %arg1: memref<1x4x128xf32, #tpu.memory_space<vmem>>, %arg2: memref<256x128xbf16, #tpu.memory_space<vmem>>, %arg3: memref<256x128xbf16, #tpu.memory_space<vmem>>, %arg4: memref<256x128xbf16, #tpu.memory_space<vmem>>, %arg5: memref<256x128xbf16, #tpu.memory_space<vmem>>, %arg6: memref<384x48xbf16, #tpu.memory_space<vmem>>, %arg7: memref<1x128xf32, #tpu.memory_space<vmem>>, %arg8: memref<1x128xf32, #tpu.memory_space<vmem>>, %arg9: memref<1x48xf32, #tpu.memory_space<vmem>>, %arg10: memref<1x16x48xf32, #tpu.memory_space<vmem>>, %arg11: memref<6x128xf32, #tpu.memory_space<vmem>>, %arg12: memref<10x128xf32, #tpu.memory_space<vmem>>, %arg13: memref<18x128xf32, #tpu.memory_space<vmem>>) attributes {dimension_semantics = [#tpu.dimension_semantics<parallel>], iteration_bounds = array<i64: 2>, scalar_prefetch = 0 : i64, scratch_operands = 3 : i64, tpu.core_type = #tpu.core_type<tc>, window_params = [{transform_indices = @transform_0, window_bounds = array<i64: 1, 4, 128>}, {pipeline_mode = #tpu.pipeline_mode<synchronous>, transform_indices = @transform_1, window_bounds = array<i64: 256, 128>}, {pipeline_mode = #tpu.pipeline_mode<synchronous>, transform_indices = @transform_2, window_bounds = array<i64: 256, 128>}, {pipeline_mode = #tpu.pipeline_mode<synchronous>, transform_indices = @transform_3, window_bounds = array<i64: 256, 128>}, {pipeline_mode = #tpu.pipeline_mode<synchronous>, transform_indices = @transform_4, window_bounds = array<i64: 256, 128>}, {pipeline_mode = #tpu.pipeline_mode<synchronous>, transform_indices = @transform_5, window_bounds = array<i64: 384, 48>}, {pipeline_mode = #tpu.pipeline_mode<synchronous>, transform_indices = @transform_6, window_bounds = array<i64: 1, 128>}, {pipeline_mode = #tpu.pipeline_mode<synchronous>, transform_indices = @transform_7, window_bounds = array<i64: 1, 128>}, {pipeline_mode = #tpu.pipeline_mode<synchronous>, transform_indices = @transform_8, window_bounds = array<i64: 1, 48>}, {transform_indices = @transform_9, window_bounds = array<i64: 1, 16, 48>}]} {
    %cst = arith.constant 0.000000e+00 : f32
    %0 = vector.broadcast %cst : f32 to vector<6x128xf32>
    %c0 = arith.constant 0 : index
    %c0_0 = arith.constant 0 : index
    %1 = vector.load %arg11[%c0, %c0_0] : memref<6x128xf32, #tpu.memory_space<vmem>>, vector<6x128xf32>
    tpu.vector_store %arg11[%c0, %c0_0], %0 {strides = array<i32>} : memref<6x128xf32, #tpu.memory_space<vmem>>, vector<6x128xf32>,
    %c0_1 = arith.constant 0 : index
    %c0_2 = arith.constant 0 : index
    %c0_3 = arith.constant 0 : index
    %2 = vector.load %arg1[%c0_1, %c0_2, %c0_3] : memref<1x4x128xf32, #tpu.memory_space<vmem>>, vector<1x4x128xf32>
    %3 = vector.shape_cast %2 : vector<1x4x128xf32> to vector<4x128xf32>
    %c1 = arith.constant 1 : index
    %c0_4 = arith.constant 0 : index
    %4 = vector.load %arg11[%c1, %c0_4] : memref<6x128xf32, #tpu.memory_space<vmem>>, vector<4x128xf32>
    tpu.vector_store %arg11[%c1, %c0_4], %3 {strides = array<i32>} : memref<6x128xf32, #tpu.memory_space<vmem>>, vector<4x128xf32>,
    %cst_5 = arith.constant 0.000000e+00 : f32
    %5 = vector.broadcast %cst_5 : f32 to vector<10x128xf32>
    %c0_6 = arith.constant 0 : index
    %c0_7 = arith.constant 0 : index
    %6 = vector.load %arg12[%c0_6, %c0_7] : memref<10x128xf32, #tpu.memory_space<vmem>>, vector<10x128xf32>
    tpu.vector_store %arg12[%c0_6, %c0_7], %5 {strides = array<i32>} : memref<10x128xf32, #tpu.memory_space<vmem>>, vector<10x128xf32>,
    %c0_8 = arith.constant 0 : index
    %c0_9 = arith.constant 0 : index
    %7 = vector.load %arg11[%c0_8, %c0_9] : memref<6x128xf32, #tpu.memory_space<vmem>>, vector<4x128xf32>
    %c1_10 = arith.constant 1 : index
    %c0_11 = arith.constant 0 : index
    %8 = vector.load %arg11[%c1_10, %c0_11] : memref<6x128xf32, #tpu.memory_space<vmem>>, vector<4x128xf32>
    %9 = tpu.concatenate %7, %8 in 1 : vector<4x128xf32>, vector<4x128xf32> -> vector<4x256xf32>
    %10 = arith.truncf %9 : vector<4x256xf32> to vector<4x256xbf16>
    %c0_12 = arith.constant 0 : index
    %c0_13 = arith.constant 0 : index
    %11 = vector.load %arg2[%c0_12, %c0_13] : memref<256x128xbf16, #tpu.memory_space<vmem>>, vector<256x128xbf16>
    %cst_14 = arith.constant dense<0.000000e+00> : vector<4x128xf32>
    %12 = tpu.matmul %10, %11, %cst_14 {dimension_numbers = #tpu.dot_dimension_numbers<[1], [0], [0], [1], [0, 0, 1, 1], [], []>} : vector<4x256xbf16>, vector<256x128xbf16>, vector<4x128xf32> -> vector<4x128xf32>
    %c0_15 = arith.constant 0 : index
    %c0_16 = arith.constant 0 : index
    %13 = vector.load %arg7[%c0_15, %c0_16] : memref<1x128xf32, #tpu.memory_space<vmem>>, vector<1x128xf32>
    %14 = vector.broadcast %13 : vector<1x128xf32> to vector<4x128xf32>
    %15 = arith.addf %12, %14 : vector<4x128xf32>
    %cst_17 = arith.constant 0.000000e+00 : f32
    %16 = vector.broadcast %cst_17 : f32 to vector<4x128xf32>
    %17 = arith.maximumf %15, %16 : vector<4x128xf32>
    %18 = vector.extract_strided_slice %17 {offsets = [0, 0], sizes = [1, 128], strides = [1, 1]} : vector<4x128xf32> to vector<1x128xf32>
    %c1_18 = arith.constant 1 : index
    %c0_19 = arith.constant 0 : index
    %19 = vector.load %arg12[%c1_18, %c0_19] : memref<10x128xf32, #tpu.memory_space<vmem>>, vector<1x128xf32>
    tpu.vector_store %arg12[%c1_18, %c0_19], %18 {strides = array<i32>} : memref<10x128xf32, #tpu.memory_space<vmem>>, vector<1x128xf32>,
    %20 = vector.extract_strided_slice %17 {offsets = [1, 0], sizes = [1, 128], strides = [1, 1]} : vector<4x128xf32> to vector<1x128xf32>
    %c3 = arith.constant 3 : index
    %c0_20 = arith.constant 0 : index
    %21 = vector.load %arg12[%c3, %c0_20] : memref<10x128xf32, #tpu.memory_space<vmem>>, vector<1x128xf32>
    tpu.vector_store %arg12[%c3, %c0_20], %20 {strides = array<i32>} : memref<10x128xf32, #tpu.memory_space<vmem>>, vector<1x128xf32>,
    %22 = vector.extract_strided_slice %17 {offsets = [2, 0], sizes = [1, 128], strides = [1, 1]} : vector<4x128xf32> to vector<1x128xf32>
    %c5 = arith.constant 5 : index
    %c0_21 = arith.constant 0 : index
    %23 = vector.load %arg12[%c5, %c0_21] : memref<10x128xf32, #tpu.memory_space<vmem>>, vector<1x128xf32>
    tpu.vector_store %arg12[%c5, %c0_21], %22 {strides = array<i32>} : memref<10x128xf32, #tpu.memory_space<vmem>>, vector<1x128xf32>,
    %24 = vector.extract_strided_slice %17 {offsets = [3, 0], sizes = [1, 128], strides = [1, 1]} : vector<4x128xf32> to vector<1x128xf32>
    %c7 = arith.constant 7 : index
    %c0_22 = arith.constant 0 : index
    %25 = vector.load %arg12[%c7, %c0_22] : memref<10x128xf32, #tpu.memory_space<vmem>>, vector<1x128xf32>
    tpu.vector_store %arg12[%c7, %c0_22], %24 {strides = array<i32>} : memref<10x128xf32, #tpu.memory_space<vmem>>, vector<1x128xf32>,
    %c1_23 = arith.constant 1 : index
    %c0_24 = arith.constant 0 : index
    %26 = vector.load %arg11[%c1_23, %c0_24] : memref<6x128xf32, #tpu.memory_space<vmem>>, vector<4x128xf32>
    %c2 = arith.constant 2 : index
    %c0_25 = arith.constant 0 : index
    %27 = vector.load %arg11[%c2, %c0_25] : memref<6x128xf32, #tpu.memory_space<vmem>>, vector<4x128xf32>
    %28 = tpu.concatenate %26, %27 in 1 : vector<4x128xf32>, vector<4x128xf32> -> vector<4x256xf32>
    %29 = arith.truncf %28 : vector<4x256xf32> to vector<4x256xbf16>
    %c0_26 = arith.constant 0 : index
    %c0_27 = arith.constant 0 : index
    %30 = vector.load %arg3[%c0_26, %c0_27] : memref<256x128xbf16, #tpu.memory_space<vmem>>, vector<256x128xbf16>
    %cst_28 = arith.constant dense<0.000000e+00> : vector<4x128xf32>
    %31 = tpu.matmul %29, %30, %cst_28 {dimension_numbers = #tpu.dot_dimension_numbers<[1], [0], [0], [1], [0, 0, 1, 1], [], []>} : vector<4x256xbf16>, vector<256x128xbf16>, vector<4x128xf32> -> vector<4x128xf32>
    %c0_29 = arith.constant 0 : index
    %c0_30 = arith.constant 0 : index
    %32 = vector.load %arg7[%c0_29, %c0_30] : memref<1x128xf32, #tpu.memory_space<vmem>>, vector<1x128xf32>
    %33 = vector.broadcast %32 : vector<1x128xf32> to vector<4x128xf32>
    %34 = arith.addf %31, %33 : vector<4x128xf32>
    %cst_31 = arith.constant 0.000000e+00 : f32
    %35 = vector.broadcast %cst_31 : f32 to vector<4x128xf32>
    %36 = arith.maximumf %34, %35 : vector<4x128xf32>
    %37 = vector.extract_strided_slice %36 {offsets = [0, 0], sizes = [1, 128], strides = [1, 1]} : vector<4x128xf32> to vector<1x128xf32>
    %c2_32 = arith.constant 2 : index
    %c0_33 = arith.constant 0 : index
    %38 = vector.load %arg12[%c2_32, %c0_33] : memref<10x128xf32, #tpu.memory_space<vmem>>, vector<1x128xf32>
    tpu.vector_store %arg12[%c2_32, %c0_33], %37 {strides = array<i32>} : memref<10x128xf32, #tpu.memory_space<vmem>>, vector<1x128xf32>,
    %39 = vector.extract_strided_slice %36 {offsets = [1, 0], sizes = [1, 128], strides = [1, 1]} : vector<4x128xf32> to vector<1x128xf32>
    %c4 = arith.constant 4 : index
    %c0_34 = arith.constant 0 : index
    %40 = vector.load %arg12[%c4, %c0_34] : memref<10x128xf32, #tpu.memory_space<vmem>>, vector<1x128xf32>
    tpu.vector_store %arg12[%c4, %c0_34], %39 {strides = array<i32>} : memref<10x128xf32, #tpu.memory_space<vmem>>, vector<1x128xf32>,
    %41 = vector.extract_strided_slice %36 {offsets = [2, 0], sizes = [1, 128], strides = [1, 1]} : vector<4x128xf32> to vector<1x128xf32>
    %c6 = arith.constant 6 : index
    %c0_35 = arith.constant 0 : index
    %42 = vector.load %arg12[%c6, %c0_35] : memref<10x128xf32, #tpu.memory_space<vmem>>, vector<1x128xf32>
    tpu.vector_store %arg12[%c6, %c0_35], %41 {strides = array<i32>} : memref<10x128xf32, #tpu.memory_space<vmem>>, vector<1x128xf32>,
    %43 = vector.extract_strided_slice %36 {offsets = [3, 0], sizes = [1, 128], strides = [1, 1]} : vector<4x128xf32> to vector<1x128xf32>
    %c8 = arith.constant 8 : index
    %c0_36 = arith.constant 0 : index
    %44 = vector.load %arg12[%c8, %c0_36] : memref<10x128xf32, #tpu.memory_space<vmem>>, vector<1x128xf32>
    tpu.vector_store %arg12[%c8, %c0_36], %43 {strides = array<i32>} : memref<10x128xf32, #tpu.memory_space<vmem>>, vector<1x128xf32>,
    %cst_37 = arith.constant 0.000000e+00 : f32
    %45 = vector.broadcast %cst_37 : f32 to vector<18x128xf32>
    %c0_38 = arith.constant 0 : index
    %c0_39 = arith.constant 0 : index
    %46 = vector.load %arg13[%c0_38, %c0_39] : memref<18x128xf32, #tpu.memory_space<vmem>>, vector<18x128xf32>
    tpu.vector_store %arg13[%c0_38, %c0_39], %45 {strides = array<i32>} : memref<18x128xf32, #tpu.memory_space<vmem>>, vector<18x128xf32>,
    %c0_40 = arith.constant 0 : index
    %c0_41 = arith.constant 0 : index
    %47 = vector.load %arg12[%c0_40, %c0_41] : memref<10x128xf32, #tpu.memory_space<vmem>>, vector<8x128xf32>
    %c1_42 = arith.constant 1 : index
    %c0_43 = arith.constant 0 : index
    %48 = vector.load %arg12[%c1_42, %c0_43] : memref<10x128xf32, #tpu.memory_space<vmem>>, vector<8x128xf32>
    %49 = tpu.concatenate %47, %48 in 1 : vector<8x128xf32>, vector<8x128xf32> -> vector<8x256xf32>
    %50 = arith.truncf %49 : vector<8x256xf32> to vector<8x256xbf16>
    %c0_44 = arith.constant 0 : index
    %c0_45 = arith.constant 0 : index
    %51 = vector.load %arg4[%c0_44, %c0_45] : memref<256x128xbf16, #tpu.memory_space<vmem>>, vector<256x128xbf16>
    %cst_46 = arith.constant dense<0.000000e+00> : vector<8x128xf32>
    %52 = tpu.matmul %50, %51, %cst_46 {dimension_numbers = #tpu.dot_dimension_numbers<[1], [0], [0], [1], [0, 0, 1, 1], [], []>} : vector<8x256xbf16>, vector<256x128xbf16>, vector<8x128xf32> -> vector<8x128xf32>
    %c0_47 = arith.constant 0 : index
    %c0_48 = arith.constant 0 : index
    %53 = vector.load %arg8[%c0_47, %c0_48] : memref<1x128xf32, #tpu.memory_space<vmem>>, vector<1x128xf32>
    %54 = vector.broadcast %53 : vector<1x128xf32> to vector<8x128xf32>
    %55 = arith.addf %52, %54 : vector<8x128xf32>
    %cst_49 = arith.constant 0.000000e+00 : f32
    %56 = vector.broadcast %cst_49 : f32 to vector<8x128xf32>
    %57 = arith.maximumf %55, %56 : vector<8x128xf32>
    %58 = vector.extract_strided_slice %57 {offsets = [0, 0], sizes = [1, 128], strides = [1, 1]} : vector<8x128xf32> to vector<1x128xf32>
    %c1_50 = arith.constant 1 : index
    %c0_51 = arith.constant 0 : index
    %59 = vector.load %arg13[%c1_50, %c0_51] : memref<18x128xf32, #tpu.memory_space<vmem>>, vector<1x128xf32>
    tpu.vector_store %arg13[%c1_50, %c0_51], %58 {strides = array<i32>} : memref<18x128xf32, #tpu.memory_space<vmem>>, vector<1x128xf32>,
    %60 = vector.extract_strided_slice %57 {offsets = [1, 0], sizes = [1, 128], strides = [1, 1]} : vector<8x128xf32> to vector<1x128xf32>
    %c3_52 = arith.constant 3 : index
    %c0_53 = arith.constant 0 : index
    %61 = vector.load %arg13[%c3_52, %c0_53] : memref<18x128xf32, #tpu.memory_space<vmem>>, vector<1x128xf32>
    tpu.vector_store %arg13[%c3_52, %c0_53], %60 {strides = array<i32>} : memref<18x128xf32, #tpu.memory_space<vmem>>, vector<1x128xf32>,
    %62 = vector.extract_strided_slice %57 {offsets = [2, 0], sizes = [1, 128], strides = [1, 1]} : vector<8x128xf32> to vector<1x128xf32>
    %c5_54 = arith.constant 5 : index
    %c0_55 = arith.constant 0 : index
    %63 = vector.load %arg13[%c5_54, %c0_55] : memref<18x128xf32, #tpu.memory_space<vmem>>, vector<1x128xf32>
    tpu.vector_store %arg13[%c5_54, %c0_55], %62 {strides = array<i32>} : memref<18x128xf32, #tpu.memory_space<vmem>>, vector<1x128xf32>,
    %64 = vector.extract_strided_slice %57 {offsets = [3, 0], sizes = [1, 128], strides = [1, 1]} : vector<8x128xf32> to vector<1x128xf32>
    %c7_56 = arith.constant 7 : index
    %c0_57 = arith.constant 0 : index
    %65 = vector.load %arg13[%c7_56, %c0_57] : memref<18x128xf32, #tpu.memory_space<vmem>>, vector<1x128xf32>
    tpu.vector_store %arg13[%c7_56, %c0_57], %64 {strides = array<i32>} : memref<18x128xf32, #tpu.memory_space<vmem>>, vector<1x128xf32>,
    %66 = vector.extract_strided_slice %57 {offsets = [4, 0], sizes = [1, 128], strides = [1, 1]} : vector<8x128xf32> to vector<1x128xf32>
    %c9 = arith.constant 9 : index
    %c0_58 = arith.constant 0 : index
    %67 = vector.load %arg13[%c9, %c0_58] : memref<18x128xf32, #tpu.memory_space<vmem>>, vector<1x128xf32>
    tpu.vector_store %arg13[%c9, %c0_58], %66 {strides = array<i32>} : memref<18x128xf32, #tpu.memory_space<vmem>>, vector<1x128xf32>,
    %68 = vector.extract_strided_slice %57 {offsets = [5, 0], sizes = [1, 128], strides = [1, 1]} : vector<8x128xf32> to vector<1x128xf32>
    %c11 = arith.constant 11 : index
    %c0_59 = arith.constant 0 : index
    %69 = vector.load %arg13[%c11, %c0_59] : memref<18x128xf32, #tpu.memory_space<vmem>>, vector<1x128xf32>
    tpu.vector_store %arg13[%c11, %c0_59], %68 {strides = array<i32>} : memref<18x128xf32, #tpu.memory_space<vmem>>, vector<1x128xf32>,
    %70 = vector.extract_strided_slice %57 {offsets = [6, 0], sizes = [1, 128], strides = [1, 1]} : vector<8x128xf32> to vector<1x128xf32>
    %c13 = arith.constant 13 : index
    %c0_60 = arith.constant 0 : index
    %71 = vector.load %arg13[%c13, %c0_60] : memref<18x128xf32, #tpu.memory_space<vmem>>, vector<1x128xf32>
    tpu.vector_store %arg13[%c13, %c0_60], %70 {strides = array<i32>} : memref<18x128xf32, #tpu.memory_space<vmem>>, vector<1x128xf32>,
    %72 = vector.extract_strided_slice %57 {offsets = [7, 0], sizes = [1, 128], strides = [1, 1]} : vector<8x128xf32> to vector<1x128xf32>
    %c15 = arith.constant 15 : index
    %c0_61 = arith.constant 0 : index
    %73 = vector.load %arg13[%c15, %c0_61] : memref<18x128xf32, #tpu.memory_space<vmem>>, vector<1x128xf32>
    tpu.vector_store %arg13[%c15, %c0_61], %72 {strides = array<i32>} : memref<18x128xf32, #tpu.memory_space<vmem>>, vector<1x128xf32>,
    %c1_62 = arith.constant 1 : index
    %c0_63 = arith.constant 0 : index
    %74 = vector.load %arg12[%c1_62, %c0_63] : memref<10x128xf32, #tpu.memory_space<vmem>>, vector<8x128xf32>
    %c2_64 = arith.constant 2 : index
    %c0_65 = arith.constant 0 : index
    %75 = vector.load %arg12[%c2_64, %c0_65] : memref<10x128xf32, #tpu.memory_space<vmem>>, vector<8x128xf32>
    %76 = tpu.concatenate %74, %75 in 1 : vector<8x128xf32>, vector<8x128xf32> -> vector<8x256xf32>
    %77 = arith.truncf %76 : vector<8x256xf32> to vector<8x256xbf16>
    %c0_66 = arith.constant 0 : index
    %c0_67 = arith.constant 0 : index
    %78 = vector.load %arg5[%c0_66, %c0_67] : memref<256x128xbf16, #tpu.memory_space<vmem>>, vector<256x128xbf16>
    %cst_68 = arith.constant dense<0.000000e+00> : vector<8x128xf32>
    %79 = tpu.matmul %77, %78, %cst_68 {dimension_numbers = #tpu.dot_dimension_numbers<[1], [0], [0], [1], [0, 0, 1, 1], [], []>} : vector<8x256xbf16>, vector<256x128xbf16>, vector<8x128xf32> -> vector<8x128xf32>
    %c0_69 = arith.constant 0 : index
    %c0_70 = arith.constant 0 : index
    %80 = vector.load %arg8[%c0_69, %c0_70] : memref<1x128xf32, #tpu.memory_space<vmem>>, vector<1x128xf32>
    %81 = vector.broadcast %80 : vector<1x128xf32> to vector<8x128xf32>
    %82 = arith.addf %79, %81 : vector<8x128xf32>
    %cst_71 = arith.constant 0.000000e+00 : f32
    %83 = vector.broadcast %cst_71 : f32 to vector<8x128xf32>
    %84 = arith.maximumf %82, %83 : vector<8x128xf32>
    %85 = vector.extract_strided_slice %84 {offsets = [0, 0], sizes = [1, 128], strides = [1, 1]} : vector<8x128xf32> to vector<1x128xf32>
    %c2_72 = arith.constant 2 : index
    %c0_73 = arith.constant 0 : index
    %86 = vector.load %arg13[%c2_72, %c0_73] : memref<18x128xf32, #tpu.memory_space<vmem>>, vector<1x128xf32>
    tpu.vector_store %arg13[%c2_72, %c0_73], %85 {strides = array<i32>} : memref<18x128xf32, #tpu.memory_space<vmem>>, vector<1x128xf32>,
    %87 = vector.extract_strided_slice %84 {offsets = [1, 0], sizes = [1, 128], strides = [1, 1]} : vector<8x128xf32> to vector<1x128xf32>
    %c4_74 = arith.constant 4 : index
    %c0_75 = arith.constant 0 : index
    %88 = vector.load %arg13[%c4_74, %c0_75] : memref<18x128xf32, #tpu.memory_space<vmem>>, vector<1x128xf32>
    tpu.vector_store %arg13[%c4_74, %c0_75], %87 {strides = array<i32>} : memref<18x128xf32, #tpu.memory_space<vmem>>, vector<1x128xf32>,
    %89 = vector.extract_strided_slice %84 {offsets = [2, 0], sizes = [1, 128], strides = [1, 1]} : vector<8x128xf32> to vector<1x128xf32>
    %c6_76 = arith.constant 6 : index
    %c0_77 = arith.constant 0 : index
    %90 = vector.load %arg13[%c6_76, %c0_77] : memref<18x128xf32, #tpu.memory_space<vmem>>, vector<1x128xf32>
    tpu.vector_store %arg13[%c6_76, %c0_77], %89 {strides = array<i32>} : memref<18x128xf32, #tpu.memory_space<vmem>>, vector<1x128xf32>,
    %91 = vector.extract_strided_slice %84 {offsets = [3, 0], sizes = [1, 128], strides = [1, 1]} : vector<8x128xf32> to vector<1x128xf32>
    %c8_78 = arith.constant 8 : index
    %c0_79 = arith.constant 0 : index
    %92 = vector.load %arg13[%c8_78, %c0_79] : memref<18x128xf32, #tpu.memory_space<vmem>>, vector<1x128xf32>
    tpu.vector_store %arg13[%c8_78, %c0_79], %91 {strides = array<i32>} : memref<18x128xf32, #tpu.memory_space<vmem>>, vector<1x128xf32>,
    %93 = vector.extract_strided_slice %84 {offsets = [4, 0], sizes = [1, 128], strides = [1, 1]} : vector<8x128xf32> to vector<1x128xf32>
    %c10 = arith.constant 10 : index
    %c0_80 = arith.constant 0 : index
    %94 = vector.load %arg13[%c10, %c0_80] : memref<18x128xf32, #tpu.memory_space<vmem>>, vector<1x128xf32>
    tpu.vector_store %arg13[%c10, %c0_80], %93 {strides = array<i32>} : memref<18x128xf32, #tpu.memory_space<vmem>>, vector<1x128xf32>,
    %95 = vector.extract_strided_slice %84 {offsets = [5, 0], sizes = [1, 128], strides = [1, 1]} : vector<8x128xf32> to vector<1x128xf32>
    %c12 = arith.constant 12 : index
    %c0_81 = arith.constant 0 : index
    %96 = vector.load %arg13[%c12, %c0_81] : memref<18x128xf32, #tpu.memory_space<vmem>>, vector<1x128xf32>
    tpu.vector_store %arg13[%c12, %c0_81], %95 {strides = array<i32>} : memref<18x128xf32, #tpu.memory_space<vmem>>, vector<1x128xf32>,
    %97 = vector.extract_strided_slice %84 {offsets = [6, 0], sizes = [1, 128], strides = [1, 1]} : vector<8x128xf32> to vector<1x128xf32>
    %c14 = arith.constant 14 : index
    %c0_82 = arith.constant 0 : index
    %98 = vector.load %arg13[%c14, %c0_82] : memref<18x128xf32, #tpu.memory_space<vmem>>, vector<1x128xf32>
    tpu.vector_store %arg13[%c14, %c0_82], %97 {strides = array<i32>} : memref<18x128xf32, #tpu.memory_space<vmem>>, vector<1x128xf32>,
    %99 = vector.extract_strided_slice %84 {offsets = [7, 0], sizes = [1, 128], strides = [1, 1]} : vector<8x128xf32> to vector<1x128xf32>
    %c16 = arith.constant 16 : index
    %c0_83 = arith.constant 0 : index
    %100 = vector.load %arg13[%c16, %c0_83] : memref<18x128xf32, #tpu.memory_space<vmem>>, vector<1x128xf32>
    tpu.vector_store %arg13[%c16, %c0_83], %99 {strides = array<i32>} : memref<18x128xf32, #tpu.memory_space<vmem>>, vector<1x128xf32>,
    %c0_84 = arith.constant 0 : index
    %c0_85 = arith.constant 0 : index
    %101 = vector.load %arg13[%c0_84, %c0_85] : memref<18x128xf32, #tpu.memory_space<vmem>>, vector<16x128xf32>
    %c1_86 = arith.constant 1 : index
    %c0_87 = arith.constant 0 : index
    %102 = vector.load %arg13[%c1_86, %c0_87] : memref<18x128xf32, #tpu.memory_space<vmem>>, vector<16x128xf32>
    %c2_88 = arith.constant 2 : index
    %c0_89 = arith.constant 0 : index
    %103 = vector.load %arg13[%c2_88, %c0_89] : memref<18x128xf32, #tpu.memory_space<vmem>>, vector<16x128xf32>
    %104 = tpu.concatenate %101, %102, %103 in 1 : vector<16x128xf32>, vector<16x128xf32>, vector<16x128xf32> -> vector<16x384xf32>
    %105 = arith.truncf %104 : vector<16x384xf32> to vector<16x384xbf16>
    %c0_90 = arith.constant 0 : index
    %c0_91 = arith.constant 0 : index
    %106 = vector.load %arg6[%c0_90, %c0_91] : memref<384x48xbf16, #tpu.memory_space<vmem>>, vector<384x48xbf16>
    %cst_92 = arith.constant dense<0.000000e+00> : vector<16x48xf32>
    %107 = tpu.matmul %105, %106, %cst_92 {dimension_numbers = #tpu.dot_dimension_numbers<[1], [0], [0], [1], [0, 0, 1, 1], [], []>} : vector<16x384xbf16>, vector<384x48xbf16>, vector<16x48xf32> -> vector<16x48xf32>
    %c0_93 = arith.constant 0 : index
    %c0_94 = arith.constant 0 : index
    %108 = vector.load %arg9[%c0_93, %c0_94] : memref<1x48xf32, #tpu.memory_space<vmem>>, vector<1x48xf32>
    %109 = vector.broadcast %108 : vector<1x48xf32> to vector<16x48xf32>
    %110 = arith.addf %107, %109 : vector<16x48xf32>
    %111 = math.tanh %110 : vector<16x48xf32>
    %c0_95 = arith.constant 0 : index
    %c0_96 = arith.constant 0 : index
    %c0_97 = arith.constant 0 : index
    %112 = vector.load %arg10[%c0_95, %c0_96, %c0_97] : memref<1x16x48xf32, #tpu.memory_space<vmem>>, vector<1x16x48xf32>
    %113 = vector.shape_cast %112 : vector<1x16x48xf32> to vector<16x48xf32>
    %114 = vector.shape_cast %111 : vector<16x48xf32> to vector<1x16x48xf32>
    tpu.vector_store %arg10[%c0_95, %c0_96, %c0_97], %114 {strides = array<i32>} : memref<1x16x48xf32, #tpu.memory_space<vmem>>, vector<1x16x48xf32>,
    return
  }
  func.func @transform_0(%arg0: i32) -> (i32, i32, i32) {
    %c0_i32 = arith.constant 0 : i32
    %c0_i32_0 = arith.constant 0 : i32
    %c0_i32_1 = arith.constant 0 : i32
    return %arg0, %c0_i32, %c0_i32_0 : i32, i32, i32
  }
  func.func @transform_1(%arg0: i32) -> (i32, i32) {
    %c0_i32 = arith.constant 0 : i32
    %c0_i32_0 = arith.constant 0 : i32
    %c0_i32_1 = arith.constant 0 : i32
    return %c0_i32, %c0_i32_0 : i32, i32
  }
  func.func @transform_2(%arg0: i32) -> (i32, i32) {
    %c0_i32 = arith.constant 0 : i32
    %c0_i32_0 = arith.constant 0 : i32
    %c0_i32_1 = arith.constant 0 : i32
    return %c0_i32, %c0_i32_0 : i32, i32
  }
  func.func @transform_3(%arg0: i32) -> (i32, i32) {
    %c0_i32 = arith.constant 0 : i32
    %c0_i32_0 = arith.constant 0 : i32
    %c0_i32_1 = arith.constant 0 : i32
    return %c0_i32, %c0_i32_0 : i32, i32
  }
  func.func @transform_4(%arg0: i32) -> (i32, i32) {
    %c0_i32 = arith.constant 0 : i32
    %c0_i32_0 = arith.constant 0 : i32
    %c0_i32_1 = arith.constant 0 : i32
    return %c0_i32, %c0_i32_0 : i32, i32
  }
  func.func @transform_5(%arg0: i32) -> (i32, i32) {
    %c0_i32 = arith.constant 0 : i32
    %c0_i32_0 = arith.constant 0 : i32
    %c0_i32_1 = arith.constant 0 : i32
    return %c0_i32, %c0_i32_0 : i32, i32
  }
  func.func @transform_6(%arg0: i32) -> (i32, i32) {
    %c0_i32 = arith.constant 0 : i32
    %c0_i32_0 = arith.constant 0 : i32
    %c0_i32_1 = arith.constant 0 : i32
    return %c0_i32, %c0_i32_0 : i32, i32
  }
  func.func @transform_7(%arg0: i32) -> (i32, i32) {
    %c0_i32 = arith.constant 0 : i32
    %c0_i32_0 = arith.constant 0 : i32
    %c0_i32_1 = arith.constant 0 : i32
    return %c0_i32, %c0_i32_0 : i32, i32
  }
  func.func @transform_8(%arg0: i32) -> (i32, i32) {
    %c0_i32 = arith.constant 0 : i32
    %c0_i32_0 = arith.constant 0 : i32
    %c0_i32_1 = arith.constant 0 : i32
    return %c0_i32, %c0_i32_0 : i32, i32
  }
  func.func @transform_9(%arg0: i32) -> (i32, i32, i32) {
    %c0_i32 = arith.constant 0 : i32
    %c0_i32_0 = arith.constant 0 : i32
    %c0_i32_1 = arith.constant 0 : i32
    return %arg0, %c0_i32, %c0_i32_0 : i32, i32, i32
  }
}

</mosaic_0001>

<bundles_post_ra>
// kernel: image_decoder_forward.1
= control target key start
LH: loop header
LB: loop body
LE: loop exit
PB: predicated region body
PF: predicated region fallthrough
CT: control target
= control target key end

     0   :  { %14 = vsyncpa [#allocation6], 0  ;;  %s2274_s0 = inlined_call_operand.vmem [shape: f32[2,4,128], index: 0, kind: input, shape index: {}]   ;;  %s2275_s1 = inlined_call_operand.vmem [shape: bf16[256,128], index: 1, kind: input, shape index: {}]   ;;  %s2276_s2 = inlined_call_operand.vmem [shape: bf16[256,128], index: 2, kind: input, shape index: {}]   ;;  %s2277_s3 = inlined_call_operand.hbm [shape: bf16[256,128], index: 3, kind: input, shape index: {}]   ;;  %s2278_s4 = inlined_call_operand.hbm [shape: bf16[256,128], index: 4, kind: input, shape index: {}]   ;;  %s2279_s5 = inlined_call_operand.vmem [shape: bf16[384,48], index: 5, kind: input, shape index: {}]   ;;  %s2280_s6 = inlined_call_operand.vmem [shape: f32[1,128], index: 6, kind: input, shape index: {}]   ;;  %s2281_s7 = inlined_call_operand.vmem [shape: f32[1,128], index: 7, kind: input, shape index: {}]   ;;  %s2282_s8 = inlined_call_operand.vmem [shape: f32[1,48], index: 8, kind: input, shape index: {}]   ;;  %s2283_s9 = inlined_call_operand.vmem [shape: f32[2,16,48], index: 9, kind: output, shape index: {}]  }
   0x1   :  { %15 = vsyncpa [#allocation8], 0  ;;  %s1985_s30 = smov 0  }
   0x2 LB: > { %s1991_s10 = sadd.s32 4294967295, %s1927_s30   ;;  %p1487_p0 = scmp.ge.s32.totalorder %s1927_s30, 1  ;;  %s1927_s30 = sphi %s1985_s30, %s21_s30  }
   0x3   : > { %p246_p1 = scmp.lt.s32.totalorder %s1927_s30, 3  ;;  %s1929_s11 = smov [#allocation5]  }
   0x4   : > { %s264_s12 = sshll.u32 %s1929_s11, 4  ;;  %p2284_p3 = scmp.eq.s32.totalorder %s1991_s10, 0  ;;  %s265_s12 = int_to_ptr.vmem [resolvable:$true] %s264_s12 }
   0x5   : > { %p1995_p2 = pnand %p1487_p0, %p246_p1  ;;  %s1930_s14 = smov [#allocation7]  }
   0x6   : > { %s277_s15 = sshll.u32 %s1930_s14, 4  ;;  %s1857_s19 = scalar_lea.hbm %s2277_s3, 2048  ;;  %s2008_s15 = int_to_ptr.vmem [resolvable:$true] %s277_s15 }
   0x7   : > { %s2286_s13 = scalar_select %p1995_p2, 1, 0 }
   0x8   : > { %p1740_p4 = pneg %p1995_p2  ;;  %p1858_p6 = scmp.ne.s32.totalorder %s2277_s3, %s1857_s19 }
   0x9   : > { %p1864_p10 = scmp.lt.u32.totalorder %s1857_s19, %s2277_s3 }
   0xa   : > { %p2004_p5 = pnand %p2284_p3, %p1740_p4 }
   0xc   : > { %p1859_p7 = pneg %p2004_p5 }
   0xe   : > { %p1860_p8 = pnand %p1859_p7, %p1858_p6 }
  0x10   : > { %p1861_p9 = pneg %p1860_p8 }
  0x12   : > { %p1866_p11 = pnand %p1864_p10, %p1861_p9 }
  0x14   : > { %1869 = shalt.err (!%p1866_p11)
}
  0x15   : > { %s1870_s24 = scalar_lea.vmem %s265_s12, 2048  ;;  %p1878_p1 = scmp.lt.s32.totalorder %s265_s12, %s265_s12 }
  0x16   : > { %p1871_p12 = scmp.ne.s32.totalorder %s265_s12, %s1870_s24  ;;  %p1879_p4 = scmp.lt.s32.totalorder %s1870_s24, %s1870_s24 }
  0x18   : > { %p1873_p13 = pnand %p1871_p12, %p1859_p7  ;;  %p1880_p3 = por %p1879_p4, %p1878_p1 }
  0x1a   : > { %p1874_p0 = pneg %p1873_p13 }
  0x1c   : > { %p1881_p2 = pnand %p1880_p3, %p1874_p0 }
  0x1e   : > { %1884 = shalt.err (!%p1881_p2)
}
  0x1f   : > { %s1931_s25 = smov 64   ;;  %s1932_s26 = smov 4  }
  0x20   : > { %1743 = dma.hbm_to_vmem [thread:$0]  (!%p2004_p5), %s2277_s3, 2048, %s265_s12, [#allocation6], %s1931_s25, %s1931_s25, %s1932_s26  }
  0x21   : > { %s1885_s14 = scalar_lea.hbm %s2278_s4, 2048 }
  0x22   : > { %p1886_p6 = scmp.ne.s32.totalorder %s2278_s4, %s1885_s14  ;;  %p1892_p8 = scmp.lt.u32.totalorder %s1885_s14, %s2278_s4 }
  0x24   : > { %p1888_p2 = pnand %p1886_p6, %p1859_p7 }
  0x26   : > { %p1889_p3 = pneg %p1888_p2 }
  0x28   : > { %p1894_p9 = pnand %p1892_p8, %p1889_p3 }
  0x2a   : > { %1897 = shalt.err (!%p1894_p9)
}
  0x2b   : > { %s1898_s12 = scalar_lea.vmem %s2008_s15, 2048  ;;  %p1906_p13 = scmp.lt.s32.totalorder %s2008_s15, %s2008_s15 }
  0x2c   : > { %p1899_p10 = scmp.ne.s32.totalorder %s2008_s15, %s1898_s12  ;;  %p1907_p0 = scmp.lt.s32.totalorder %s1898_s12, %s1898_s12 }
  0x2e   : > { %p1901_p11 = pnand %p1899_p10, %p1859_p7  ;;  %p1908_p1 = por %p1907_p0, %p1906_p13 }
  0x30   : > { %p1902_p12 = pneg %p1901_p11 }
  0x32   : > { %p1909_p4 = pnand %p1908_p1, %p1902_p12 }
  0x34   : > { %1912 = shalt.err (!%p1909_p4)
}
  0x35   : > { %1746 = dma.hbm_to_vmem [thread:$0]  (!%p2004_p5), %s2278_s4, 2048, %s2008_s15, [#allocation8], %s1931_s25, %s1931_s25, %s1932_s26  }
  0x36   : > { %p2288_p6 = scmp.ne.s32.totalorder %s2286_s13, 0 }
  0x37   : > { %p2289_p2 = scmp.eq.s32.totalorder (!%p2288_p6), %s1991_s10, 0 }
  0x38   : > { %312 = sbr.rel (%p2288_p6) target bundleno = 802 (0x322), region = 56 }
  0x3f   : > { %1918 = dma.done.wait (%p2289_p2), [#allocation6], 2048   ;;  %p2290_p7 = pmov %p2289_p2 }
  0x40   : > { %p2291_p3 = pmov %p2289_p2 }
  0x41   : > { %1920 = vsyncadd (%p2290_p7), [#allocation6], 4294965248 }
  0x42   : > { %1922 = dma.done.wait (%p2291_p3), [#allocation8], 2048   ;;  %p2292_p8 = pmov %p2289_p2 }
  0x43   : > { %v1933_v0 = vmov 0.0   ;;  %v1765_v1 = vld [vmem:[%s2275_s1 + $0x40] sm:$0xff]   ;;  %v1769_v5 = vld [vmem:[%s2275_s1 + $0x48] sm:$0xff]   ;;  %v1773_v9 = vld [vmem:[%s2275_s1 + $0x50] sm:$0xff]   ;;  %p351_p5 = scmp.lt.s32.totalorder %s1991_s10, 1  ;;  %vm1934_vm0 = vmmov 0  }
  0x44   : > { %1924 = vsyncadd (%p2292_p8), [#allocation8], 4294965248  ;;  %361 = vst [vmem:[#allocation2] sm:$0x3f] %v1933_v0  ;;  %v1766_v2 = vld [vmem:[%s2276_s2 + $0x40] sm:$0xff]   ;;  %1593 = vmatprep.subr.bf16.mxu0 %v1765_v1  ;;  %v1770_v6 = vld [vmem:[%s2276_s2 + $0x48] sm:$0xff]  }
  0x45   : > { %364 = vst [vmem:[#allocation3] sm:$0xff] %v1933_v0  ;;  %365 = vst [vmem:[#allocation3 + $0x8] sm:$0x3] %v1933_v0  ;;  %v1767_v3 = vld [vmem:[%s2275_s1] sm:$0xff]   ;;  %1615 = vmatprep.subr.bf16.mxu1 %v1766_v2  ;;  %v1771_v7 = vld [vmem:[%s2275_s1 + $0x8] sm:$0xff]   ;;  %s2294_s10 = smov (!%p351_p5, %s1991_s10), 1 }
  0x46   : > { %734 = vst [vmem:[#allocation4] sm:$0xff] %v1933_v0  ;;  %735 = vst [vmem:[#allocation4 + $0x8] sm:$0xff] %v1933_v0  ;;  %v1768_v4 = vld [vmem:[%s2276_s2] sm:$0xff]   ;;  %1594 = vmatpush3.bf16.msra.mxu0 %v1767_v3  ;;  %v1772_v8 = vld [vmem:[%s2276_s2 + $0x8] sm:$0xff]   ;;  %s1494_s12 = sshll.u32 %s2294_s10, 2  ;;  %s1592_s28 = sshll.u32 %s2294_s10, 4 }
  0x47   : > { %736 = vst [vmem:[#allocation4 + $0x10] sm:$0x3] %v1933_v0  ;;  %1616 = vmatpush3.bf16.msra.mxu1 %v1768_v4  ;;  %1595 = vmatprep.subr.bf16.mxu0 %v1769_v5  ;;  %v1774_v10 = vld [vmem:[%s2276_s2 + $0x50] sm:$0xff]   ;;  %v1777_v13 = vld [vmem:[%s2275_s1 + $0x58] sm:$0xff]   ;;  %v1781_v17 = vld [vmem:[%s2275_s1 + $0x60] sm:$0xff]   ;;  %s354_s26 = scalar_lea.vmem %s2274_s0, %s1494_s12  ;;  %s359_s14 = scalar_lea.vmem %s2283_s9, %s1592_s28  ;;  %vm1405_vm1 = vcmask 392192  }
  0x48   : > { %1617 = vmatprep.subr.bf16.mxu1 %v1770_v6  ;;  %v1775_v11 = vld [vmem:[%s2275_s1 + $0x10] sm:$0xff]   ;;  %v1778_v14 = vld [vmem:[%s2276_s2 + $0x58] sm:$0xff]   ;;  %v1782_v18 = vld [vmem:[%s2276_s2 + $0x60] sm:$0xff]  }
  0x49   : > { %v1776_v12 = vld [vmem:[%s2276_s2 + $0x10] sm:$0xff]   ;;  %v1779_v15 = vld [vmem:[%s2275_s1 + $0x18] sm:$0xff]   ;;  %v1783_v19 = vld [vmem:[%s2275_s1 + $0x20] sm:$0xff]  }
  0x4a   : > { %1596 = vmatpush3.bf16.msra.mxu0 %v1771_v7  ;;  %v1780_v16 = vld [vmem:[%s2276_s2 + $0x18] sm:$0xff]   ;;  %v1784_v20 = vld [vmem:[%s2276_s2 + $0x20] sm:$0xff]   ;;  %v1785_v21 = vld [vmem:[%s2275_s1 + $0x68] sm:$0xff]  }
  0x4b   : > { %1618 = vmatpush3.bf16.msra.mxu1 %v1772_v8  ;;  %1597 = vmatprep.subr.bf16.mxu0 %v1773_v9  ;;  %v1786_v22 = vld [vmem:[%s2276_s2 + $0x68] sm:$0xff]   ;;  %v1789_v25 = vld [vmem:[%s2275_s1 + $0x70] sm:$0xff]   ;;  %v1793_v29 = vld [vmem:[%s2275_s1 + $0x78] sm:$0xff]  }
  0x4c   : > { %1619 = vmatprep.subr.bf16.mxu1 %v1774_v10  ;;  %v1787_v23 = vld [vmem:[%s2275_s1 + $0x28] sm:$0xff]   ;;  %v1790_v26 = vld [vmem:[%s2276_s2 + $0x70] sm:$0xff]   ;;  %v1794_v30 = vld [vmem:[%s2276_s2 + $0x78] sm:$0xff]  }
  0x4d   : > { %v1788_v24 = vld [vmem:[%s2276_s2 + $0x28] sm:$0xff]   ;;  %v1791_v27 = vld [vmem:[%s2275_s1 + $0x30] sm:$0xff]   ;;  %v1795_v31 = vld [vmem:[%s2275_s1 + $0x38] sm:$0xff]  }
  0x4e   : > { %1598 = vmatpush3.bf16.msra.mxu0 %v1775_v11  ;;  %v1792_v28 = vld [vmem:[%s2276_s2 + $0x30] sm:$0xff]   ;;  %v1796_v32 = vld [vmem:[%s2276_s2 + $0x38] sm:$0xff]   ;;  %v362_v33 = vld [vmem:[%s354_s26] sm:$0xf] }
  0x4f   : > { %1620 = vmatpush3.bf16.msra.mxu1 %v1776_v12  ;;  %1599 = vmatprep.subr.bf16.mxu0 %v1777_v13  ;;  %363 = vst [vmem:[#allocation2 + $0x1] sm:$0xf] %v362_v33  ;;  %v1797_v34 = vld [vmem:[#allocation5 + $0x40] sm:$0xff]   ;;  %v1801_v45 = vld [vmem:[#allocation5 + $0x48] sm:$0xff]   ;;  %v1805_v50 = vld [vmem:[#allocation5 + $0x50] sm:$0xff]  }
  0x50   : > { %1621 = vmatprep.subr.bf16.mxu1 %v1778_v14  ;;  %v1798_v35 = vld [vmem:[#allocation7 + $0x40] sm:$0xff]   ;;  %v1802_v47 = vld [vmem:[#allocation7 + $0x48] sm:$0xff]   ;;  %v1806_v51 = vld [vmem:[#allocation7 + $0x50] sm:$0xff]  }
  0x51   : > { %v1799_v36 = vld [vmem:[#allocation5] sm:$0xff]   ;;  %v1803_v48 = vld [vmem:[#allocation5 + $0x8] sm:$0xff]   ;;  %v1807_v52 = vld [vmem:[#allocation5 + $0x10] sm:$0xff]  }
  0x52   : > { %1600 = vmatpush3.bf16.msra.mxu0 %v1779_v15  ;;  %v1800_v37 = vld [vmem:[#allocation7] sm:$0xff]   ;;  %v1804_v49 = vld [vmem:[#allocation7 + $0x8] sm:$0xff]   ;;  %v1808_v53 = vld [vmem:[#allocation7 + $0x10] sm:$0xff]  }
  0x53   : > { %1622 = vmatpush3.bf16.msra.mxu1 %v1780_v16  ;;  %1601 = vmatprep.subr.bf16.mxu0 %v1781_v17  ;;  %v1809_v54 = vld [vmem:[#allocation5 + $0x58] sm:$0xff]   ;;  %v1813_v58 = vld [vmem:[#allocation5 + $0x60] sm:$0xff]   ;;  %v1817_v62 = vld [vmem:[#allocation5 + $0x68] sm:$0xff]  }
  0x54   : > { %1623 = vmatprep.subr.bf16.mxu1 %v1782_v18  ;;  %v1810_v55 = vld [vmem:[#allocation7 + $0x58] sm:$0xff]   ;;  %v1814_v59 = vld [vmem:[#allocation7 + $0x60] sm:$0xff]   ;;  %v1818_v63 = vld [vmem:[#allocation7 + $0x68] sm:$0xff]  }
  0x55   : > { %v1811_v56 = vld [vmem:[#allocation5 + $0x18] sm:$0xff]   ;;  %v1815_v60 = vld [vmem:[#allocation5 + $0x20] sm:$0xff]   ;;  %v1819_v1 = vld [vmem:[#allocation5 + $0x28] sm:$0xff]  }
  0x56   : > { %1602 = vmatpush3.bf16.msra.mxu0 %v1783_v19  ;;  %v367_v38 = vld [vmem:[#allocation2 + $0x1] sm:$0xf]  ;;  %v1812_v57 = vld [vmem:[#allocation7 + $0x18] sm:$0xff]   ;;  %v1816_v61 = vld [vmem:[#allocation7 + $0x20] sm:$0xff]  }
  0x57   : > { %1624 = vmatpush3.bf16.msra.mxu1 %v1784_v20  ;;  %1603 = vmatprep.subr.bf16.mxu0 %v1785_v21  ;;  %v551_v39 = vld [vmem:[#allocation2 + $0x2] sm:$0xf]  ;;  %v369_v41 = vpack.c.bf16 %v367_v38, %v367_v38  ;;  %v1820_v2 = vld [vmem:[#allocation7 + $0x28] sm:$0xff]   ;;  %v1825_v7 = vld [vmem:[#allocation5 + $0x78] sm:$0xff]  }
  0x58   : > { %1625 = vmatprep.subr.bf16.mxu1 %v1786_v22  ;;  %v366_v40 = vld [vmem:[#allocation2] sm:$0xf]  ;;  %v553_v42 = vpack.c.bf16 %v551_v39, %v551_v39  ;;  %v1826_v8 = vld [vmem:[#allocation7 + $0x78] sm:$0xff]   ;;  %v1835_v38 = vld [vmem:[%s2279_s5 + $0x50] sm:$0xff]  }
  0x59   : > { %v368_v43 = vpack.c.bf16 %v366_v40, %v366_v40  ;;  %v550_v44 = vld [vmem:[#allocation2 + $0x1] sm:$0xf]  ;;  %537 = vmatprep.mubr.bf16.mxu0 %v369_v41  ;;  %v1827_v9 = vld [vmem:[#allocation5 + $0x38] sm:$0xff]   ;;  %v1497_v14 = vld [vmem:[%s2280_s6] ss:$0 sm:$0xff] }
  0x5a   : > { %1604 = vmatpush3.bf16.msra.mxu0 %v1787_v23  ;;  %v552_v46 = vpack.c.bf16 %v550_v44, %v550_v44  ;;  %721 = vmatprep.mubr.bf16.mxu1 %v553_v42  ;;  %v1821_v3 = vld [vmem:[#allocation5 + $0x70] sm:$0xff]   ;;  %v1828_v10 = vld [vmem:[#allocation7 + $0x38] sm:$0xff]   ;;  %v1836_v39 = vld [vmem:[%s2279_s5 + $0x90] sm:$0xff]  }
  0x5b   : > { %1626 = vmatpush3.bf16.msra.mxu1 %v1788_v24  ;;  %1605 = vmatprep.subr.bf16.mxu0 %v1789_v25  ;;  %v1822_v4 = vld [vmem:[#allocation7 + $0x70] sm:$0xff]   ;;  %v1837_v40 = vld [vmem:[%s2279_s5 + $0x10] sm:$0xff]   ;;  %v1838_v41 = vld [vmem:[%s2279_s5 + $0x58] sm:$0xff]  }
  0x5c   : > { %1627 = vmatprep.subr.bf16.mxu1 %v1790_v26  ;;  %v1823_v5 = vld [vmem:[#allocation5 + $0x30] sm:$0xff]   ;;  %v1839_v42 = vld [vmem:[%s2279_s5 + $0x98] sm:$0xff]  }
  0x5d   : > { %v1824_v6 = vld [vmem:[#allocation7 + $0x30] sm:$0xff]  }
  0x5e   : > { %1606 = vmatpush3.bf16.msra.mxu0 %v1791_v27  ;;  %v1829_v11 = vld [vmem:[%s2279_s5 + $0x40] sm:$0xff]  }
  0x5f   : > { %1628 = vmatpush3.bf16.msra.mxu1 %v1792_v28  ;;  %1607 = vmatprep.subr.bf16.mxu0 %v1793_v29  ;;  %v1830_v33 = vld [vmem:[%s2279_s5 + $0x80] sm:$0xff]  }
  0x60   : > { %1629 = vmatprep.subr.bf16.mxu1 %v1794_v30  ;;  %v1841_v44 = vld [vmem:[%s2279_s5 + $0x60] sm:$0xff]  }
  0x62   : > { %1608 = vmatpush3.bf16.msra.mxu0 %v1795_v31 }
  0x63   : > { %1630 = vmatpush3.bf16.msra.mxu1 %v1796_v32  ;;  %1637 = vmatprep.subr.bf16.mxu0 %v1797_v34  ;;  %v1831_v34 = vld [vmem:[%s2279_s5] sm:$0xff]  }
  0x64   : > { %1659 = vmatprep.subr.bf16.mxu1 %v1798_v35  ;;  %v1832_v35 = vld [vmem:[%s2279_s5 + $0x48] sm:$0xff]  }
  0x65   : > { %538 = vmatmul.mubr.bf16.vlgmr.msra.gmra.mrb[0].mxu0 %v368_v43  ;;  %v1840_v43 = vld [vmem:[%s2279_s5 + $0x18] sm:$0xff]  }
  0x66   : > { %722 = vmatmul.mubr.bf16.vlgmr.msra.gmra.mrb[0].mxu1 %v552_v46  ;;  %1638 = vmatpush3.bf16.msra.mxu0 %v1799_v36  ;;  %v1833_v36 = vld [vmem:[%s2279_s5 + $0x88] sm:$0xff]   ;;  %v1843_v46 = vld [vmem:[%s2279_s5 + $0x20] sm:$0xff]  }
  0x67   : > { %1660 = vmatpush3.bf16.msra.mxu1 %v1800_v37  ;;  %1639 = vmatprep.subr.bf16.mxu0 %v1801_v45  ;;  %v1834_v37 = vld [vmem:[%s2279_s5 + $0x8] sm:$0xff]   ;;  %v1842_v45 = vld [vmem:[%s2279_s5 + $0xa0] sm:$0xff]  }
  0x68   : > { %1661 = vmatprep.subr.bf16.mxu1 %v1802_v47  ;;  %v1844_v47 = vld [vmem:[%s2279_s5 + $0x68] sm:$0xff]  }
  0x6a   : > { %1640 = vmatpush3.bf16.msra.mxu0 %v1803_v48  ;;  %v1845_v48 = vld [vmem:[%s2279_s5 + $0xa8] sm:$0xff]  }
  0x6b   : > { %1662 = vmatpush3.bf16.msra.mxu1 %v1804_v49  ;;  %1641 = vmatprep.subr.bf16.mxu0 %v1805_v50  ;;  %v1846_v49 = vld [vmem:[%s2279_s5 + $0x28] sm:$0xff]   ;;  %v1847_v50 = vld [vmem:[%s2279_s5 + $0x70] sm:$0xff]  }
  0x6c   : > { %1663 = vmatprep.subr.bf16.mxu1 %v1806_v51  ;;  %v1848_v51 = vld [vmem:[%s2279_s5 + $0xb0] sm:$0xff]  }
  0x6e   : > { %1642 = vmatpush3.bf16.msra.mxu0 %v1807_v52  ;;  %v1849_v52 = vld [vmem:[%s2279_s5 + $0x30] sm:$0xff]  }
  0x6f   : > { %1664 = vmatpush3.bf16.msra.mxu1 %v1808_v53  ;;  %1643 = vmatprep.subr.bf16.mxu0 %v1809_v54  ;;  %v1850_v53 = vld [vmem:[%s2279_s5 + $0x78] sm:$0xff]  }
  0x70   : > { %1665 = vmatprep.subr.bf16.mxu1 %v1810_v55  ;;  %v1851_v54 = vld [vmem:[%s2279_s5 + $0xb8] sm:$0xff]  }
  0x71   : > { %v1852_v55 = vld [vmem:[%s2279_s5 + $0x38] sm:$0xff]  }
  0x72   : > { %1644 = vmatpush3.bf16.msra.mxu0 %v1811_v56 }
  0x73   : > { %1666 = vmatpush3.bf16.msra.mxu1 %v1812_v57  ;;  %1645 = vmatprep.subr.bf16.mxu0 %v1813_v58  ;;  %v1531_v58 = vld [vmem:[%s2281_s7] ss:$0 sm:$0xff] }
  0x74   : > { %1667 = vmatprep.subr.bf16.mxu1 %v1814_v59 }
  0x76   : > { %1646 = vmatpush3.bf16.msra.mxu0 %v1815_v60 }
  0x77   : > { %1668 = vmatpush3.bf16.msra.mxu1 %v1816_v61  ;;  %1647 = vmatprep.subr.bf16.mxu0 %v1817_v62 }
  0x78   : > { %1669 = vmatprep.subr.bf16.mxu1 %v1818_v63 }
  0x7a   : > { %1648 = vmatpush3.bf16.msra.mxu0 %v1819_v1 }
  0x7b   : > { %1670 = vmatpush3.bf16.msra.mxu1 %v1820_v2  ;;  %1649 = vmatprep.subr.bf16.mxu0 %v1821_v3 }
  0x7c   : > { %1671 = vmatprep.subr.bf16.mxu1 %v1822_v4 }
  0x7e   : > { %1650 = vmatpush3.bf16.msra.mxu0 %v1823_v5 }
  0x7f   : > { %1672 = vmatpush3.bf16.msra.mxu1 %v1824_v6  ;;  %1651 = vmatprep.subr.bf16.mxu0 %v1825_v7 }
  0x80   : > { %1673 = vmatprep.subr.bf16.mxu1 %v1826_v8 }
  0x82   : > { %1652 = vmatpush3.bf16.msra.mxu0 %v1827_v9 }
  0x83   : > { %1674 = vmatpush3.bf16.msra.mxu1 %v1828_v10  ;;  %1681 = vmatprep.subr.bf16.mxu0 %v1829_v11 }
  0x84   : > { %1712 = vmatprep.subr.bf16.mxu1 %v1933_v0 }
 0x138   : > { %v1609_v12 = vpop.f32.mrb[0].mxu0 }
 0x139   : > { %v1631_v13 = vpop.f32.mrb[0].mxu1  ;;  %v1610_v15 = vpop.f32.mrb[1].mxu0 }
 0x13a   : > { %v1632_v16 = vpop.f32.mrb[1].mxu1  ;;  %v1611_v17 = vadd.f32 %v1610_v15, %v1609_v12  ;;  %v1612_v19 = vpop.f32.mrb[2].mxu0 }
 0x13b   : > { %v1633_v18 = vadd.f32 %v1632_v16, %v1631_v13  ;;  %v1634_v20 = vpop.f32.mrb[2].mxu1  ;;  %v1613_v21 = vpop.f32.mrb[3].mxu0  ;;  %v1565_v19 = vld [vmem:[%s2282_s8] ss:$0 sm:$0xff] }
 0x13c   : > { %v1635_v22 = vpop.f32.mrb[3].mxu1  ;;  %v540_v23 = vadd.f32 %v1611_v17, %v1497_v14 }
 0x13d   : > { %v724_v24 = vadd.f32 %v1633_v18, %v1497_v14 }
 0x13e   : > { %v545_v25 = vmax.f32 %v540_v23, 0.0 }
 0x13f   : > { %v729_v26 = vmax.f32 %v724_v24, 0.0 }
 0x140   : > { %546 = vst [vmem:[#allocation3 + $0x1] sm:$0x1] %v545_v25  ;;  %547 = vst [vmem:[#allocation3 + $0x2] sm:$0x2] %v545_v25 }
 0x141   : > { %548 = vst [vmem:[#allocation3 + $0x3] sm:$0x4] %v545_v25  ;;  %549 = vst [vmem:[#allocation3 + $0x4] sm:$0x8] %v545_v25 }
 0x142   : > { %730 = vst [vmem:[#allocation3 + $0x2] sm:$0x1] %v729_v26  ;;  %731 = vst [vmem:[#allocation3 + $0x3] sm:$0x2] %v729_v26 }
 0x143   : > { %732 = vst [vmem:[#allocation3 + $0x4] sm:$0x4] %v729_v26  ;;  %733 = vst [vmem:[#allocation3 + $0x5] sm:$0x8] %v729_v26 }
 0x14a   : > { %v738_v27 = vld [vmem:[#allocation3 + $0x1] sm:$0xff] }
 0x14b   : > { %v926_v28 = vld [vmem:[#allocation3 + $0x2] sm:$0xff]  ;;  %v740_v30 = vpack.c.bf16 %v738_v27, %v738_v27 }
 0x14c   : > { %v737_v29 = vld [vmem:[#allocation3] sm:$0xff]  ;;  %v928_v31 = vpack.c.bf16 %v926_v28, %v926_v28 }
 0x14d   : > { %v739_v32 = vpack.c.bf16 %v737_v29, %v737_v29  ;;  %908 = vmatprep.mubr.bf16.mxu0 %v740_v30 }
 0x14e   : > { %1096 = vmatprep.mubr.bf16.mxu1 %v928_v31 }
 0x14f   : > { %909 = vmatmul.mubr.bf16.vlgmr.msra.gmra.mrb[4].mxu0 %v739_v32  ;;  %1097 = vmatmul.mubr.bf16.vlgmr.msra.gmra.mrb[4].mxu1 %v740_v30 }
 0x150   : > { %1713 = vmatpush3.bf16.msra.mxu1 %v1830_v33  ;;  %1682 = vmatpush3.bf16.msra.mxu0 %v1831_v34 }
 0x151   : > { %1714 = vmatprep.subr.bf16.mxu1 %v1933_v0  ;;  %1683 = vmatprep.subr.bf16.mxu0 %v1832_v35 }
 0x152   : > { %1728 = vmatprep.mubr.msk.bf16.mxu1 %vm1934_vm0, %v1933_v0 }
 0x154   : > { %1715 = vmatpush3.bf16.msra.mxu1 %v1833_v36  ;;  %1684 = vmatpush3.bf16.msra.mxu0 %v1834_v37 }
 0x155   : > { %1716 = vmatprep.subr.bf16.mxu1 %v1933_v0  ;;  %1685 = vmatprep.subr.bf16.mxu0 %v1835_v38 }
 0x158   : > { %1717 = vmatpush3.bf16.msra.mxu1 %v1836_v39  ;;  %1686 = vmatpush3.bf16.msra.mxu0 %v1837_v40 }
 0x159   : > { %1718 = vmatprep.subr.bf16.mxu1 %v1933_v0  ;;  %1687 = vmatprep.subr.bf16.mxu0 %v1838_v41 }
 0x15c   : > { %1719 = vmatpush3.bf16.msra.mxu1 %v1839_v42  ;;  %1688 = vmatpush3.bf16.msra.mxu0 %v1840_v43 }
 0x15d   : > { %1720 = vmatprep.subr.bf16.mxu1 %v1933_v0  ;;  %1689 = vmatprep.subr.bf16.mxu0 %v1841_v44 }
 0x160   : > { %1721 = vmatpush3.bf16.msra.mxu1 %v1842_v45  ;;  %1690 = vmatpush3.bf16.msra.mxu0 %v1843_v46 }
 0x161   : > { %1722 = vmatprep.subr.bf16.mxu1 %v1933_v0  ;;  %1691 = vmatprep.subr.bf16.mxu0 %v1844_v47 }
 0x164   : > { %1723 = vmatpush3.bf16.msra.mxu1 %v1845_v48  ;;  %1692 = vmatpush3.bf16.msra.mxu0 %v1846_v49 }
 0x165   : > { %1724 = vmatprep.subr.bf16.mxu1 %v1933_v0  ;;  %1693 = vmatprep.subr.bf16.mxu0 %v1847_v50 }
 0x168   : > { %1725 = vmatpush3.bf16.msra.mxu1 %v1848_v51  ;;  %1694 = vmatpush3.bf16.msra.mxu0 %v1849_v52 }
 0x169   : > { %1726 = vmatprep.subr.bf16.mxu1 %v1933_v0  ;;  %1695 = vmatprep.subr.bf16.mxu0 %v1850_v53 }
 0x16c   : > { %1727 = vmatpush3.bf16.msra.mxu1 %v1851_v54  ;;  %1696 = vmatpush3.bf16.msra.mxu0 %v1852_v55 }
 0x222   : > { %v1653_v56 = vpop.f32.mrb[4].mxu0  ;;  %v1675_v57 = vpop.f32.mrb[4].mxu1 }
 0x223   : > { %v1654_v59 = vpop.f32.mrb[5].mxu0  ;;  %v1676_v60 = vpop.f32.mrb[5].mxu1 }
 0x224   : > { %v1655_v61 = vadd.f32 %v1654_v59, %v1653_v56  ;;  %v1677_v62 = vadd.f32 %v1676_v60, %v1675_v57  ;;  %v1656_v63 = vpop.f32.mrb[6].mxu0  ;;  %v1678_v1 = vpop.f32.mrb[6].mxu1 }
 0x225   : > { %v1657_v0 = vpop.f32.mrb[7].mxu0  ;;  %v1679_v2 = vpop.f32.mrb[7].mxu1 }
 0x226   : > { %v911_v3 = vadd.f32 %v1655_v61, %v1531_v58  ;;  %v1099_v4 = vadd.f32 %v1677_v62, %v1531_v58 }
 0x228   : > { %v916_v5 = vmax.f32 %v911_v3, 0.0  ;;  %v1104_v6 = vmax.f32 %v1099_v4, 0.0 }
 0x22a   : > { %917 = vst [vmem:[#allocation4 + $0x1] ss:$8 sps:$4 sm:$0x11] %v916_v5   ;;  %918 = vst [vmem:[#allocation4 + $0x2] ss:$8 sps:$4 sm:$0x22] %v916_v5  }
 0x22b   : > { %919 = vst [vmem:[#allocation4 + $0x3] ss:$8 sps:$4 sm:$0x44] %v916_v5   ;;  %920 = vst [vmem:[#allocation4 + $0x4] ss:$8 sps:$4 sm:$0x88] %v916_v5  }
 0x22c   : > { %1105 = vst [vmem:[#allocation4 + $0x2] ss:$8 sps:$4 sm:$0x11] %v1104_v6   ;;  %1106 = vst [vmem:[#allocation4 + $0x3] ss:$8 sps:$4 sm:$0x22] %v1104_v6  }
 0x22d   : > { %1107 = vst [vmem:[#allocation4 + $0x4] ss:$8 sps:$4 sm:$0x44] %v1104_v6   ;;  %1108 = vst [vmem:[#allocation4 + $0x5] ss:$8 sps:$4 sm:$0x88] %v1104_v6  }
 0x234   : > { %v1115_v7 = vld [vmem:[#allocation4 + $0x1] sm:$0xff]  ;;  %v1116_v8 = vld [vmem:[#allocation4 + $0x9] sm:$0xff] }
 0x235   : > { %v1117_v9 = vld [vmem:[#allocation4 + $0x2] sm:$0xff]  ;;  %v1120_v10 = vpack.c.bf16 %v1116_v8, %v1115_v7  ;;  %v1118_v11 = vld [vmem:[#allocation4 + $0xa] sm:$0xff] }
 0x236   : > { %v1113_v12 = vld [vmem:[#allocation4] sm:$0xff]  ;;  %v1114_v13 = vld [vmem:[#allocation4 + $0x8] sm:$0xff]  ;;  %v1121_v14 = vpack.c.bf16 %v1118_v11, %v1117_v9 }
 0x237   : > { %v1119_v15 = vpack.c.bf16 %v1114_v13, %v1113_v12  ;;  %1353 = vmatprep.mubr.bf16.mxu0 %v1120_v10 }
 0x238   : > { %1729 = vmatmul.mubr.bf16.vlgmr.msra.gmra.mrb[8].mxu1 %v1121_v14 }
 0x239   : > { %1354 = vmatmul.mubr.bf16.vlgmr.msra.gmra.mrb[8].mxu0 %v1119_v15 }
 0x30b   : > { %v1396_v16 = vpop.f32.mrb[8].mxu1 }
 0x30c   : > { %v1697_v17 = vpop.f32.mrb[8].mxu0  ;;  %v1730_v18 = vpop.f32.mrb[9].mxu1 }
 0x30d   : > { %v1698_v20 = vpop.f32.mrb[9].mxu0  ;;  %v1399_v22 = vpop.f32.mrb[10].mxu1 }
 0x30e   : > { %v1699_v21 = vadd.f32 %v1698_v20, %v1697_v17  ;;  %v1700_v23 = vpop.f32.mrb[10].mxu0  ;;  %v1731_v24 = vpop.f32.mrb[11].mxu1 }
 0x30f   : > { %v1701_v25 = vpop.f32.mrb[11].mxu0 }
 0x310   : > { %v1356_v26 = vadd.f32 %v1699_v21, %v1565_v19  ;;  %v1702_v27 = vadd.f32 %v1701_v25, %v1700_v23 }
 0x312   : > { %v1397_v28 = vadd.f32 %v1396_v16, %v1356_v26  ;;  %v1359_v29 = vadd.f32 %v1702_v27, %v1565_v19 }
 0x314   : > { %1853 = vtanh.f32 %v1397_v28  ;;  %v1400_v30 = vadd.f32 %v1399_v22, %v1359_v29 }
 0x316   : > { %1855 = vtanh.f32 %v1400_v30 }
 0x31e   : > { %v1854_v31 = vpop.eup %1853 }
 0x31f   : > { %1406 = vst.msk [vmem:[%s359_s14] sm:$0xff] %vm1405_vm1, %v1854_v31 }
 0x320   : > { %v1856_v32 = vpop.eup %1855 }
 0x321   : > { %1407 = vst.msk [vmem:[%s359_s14 + $0x8] sm:$0xff] %vm1405_vm1, %v1856_v32 }
 0x322 PF: > { %s21_s30 = sadd.s32 1, %s1927_s30  }
 0x323   : > { %p18_p9 = scmp.ge.s32.totalorder %s21_s30, 4  }
 0x325   :  { %20 = sbr.rel (!%p18_p9) target bundleno = 2 (0x2), region = 95 }
 0x32c   :  { %1429 = vsyncpa [#allocation6], 1 }
 0x32d   :  { %1431 = vsyncpa [#allocation6 + $0x1], 1 }
 0x32e   :  { %1432 = vsyncpa [#allocation8], 1 }

</bundles_post_ra>
